<compile_context>
chip_gen: v6e
topology: v6e:2x2x1
jax: 0.10.0
libtpu: 0.0.40
codegen_flags: <defaults>
</compile_context>

<pallas_src>
import functools

import jax
import jax.numpy as jnp
from jax.experimental import pallas as pl
from jax.experimental.pallas import tpu as pltpu

LANES = 128
MAX_ROW_TILE = 2048              # (2048, 128) f32 block = 1 MiB (v5e-safe, v7x-range)
MIN_BLOCKS_PER_CORE = 2          # only split across cores when each gets real work
VMEM_LIMIT_BYTES = 32 * 1024 * 1024


def _num_tensorcores() -> int:
    """Best-effort TensorCores-per-device count; defaults to 1 (always safe)."""
    try:
        info = pltpu.get_tpu_info()
    except Exception:
        return 1
    for name in ("num_cores", "core_count", "num_tensorcores",
                 "tensorcore_count", "num_cores_per_chip", "cores_per_chip"):
        v = getattr(info, name, None)
        if isinstance(v, int) and 1 <= v <= 8:
            return v
    return 1


_NUM_CORES = _num_tensorcores()


def _dice_partials_kernel(yp_ref, yt_ref, inter_out, union_out,
                          inter_acc, union_acc,
                          *, inner_steps, n_rows, needs_mask):
    k = pl.program_id(1)                 # reduction step within this split
    nk = pl.num_programs(1)

    @pl.when(k == 0)
    def _init():
        inter_acc[...] = jnp.zeros_like(inter_acc)
        union_acc[...] = jnp.zeros_like(union_acc)

    rt, lanes = yp_ref.shape
    p = jax.nn.sigmoid(yp_ref[...].astype(jnp.float32))     # EUP/VPU
    t = yt_ref[...].astype(jnp.float32)

    if needs_mask:
        s = pl.program_id(0)
        base_row = (s * inner_steps + k) * rt                # logical row offset
        is_partial = base_row + rt > n_rows                  # tail or overhang block

        @pl.when(is_partial)
        def _masked():
            row = base_row + jax.lax.broadcasted_iota(jnp.int32, (rt, lanes), 0)
            keep = row < n_rows
            pm = jnp.where(keep, p, 0.0)
            tm = jnp.where(keep, t, 0.0)
            inter_acc[...] += jnp.sum(tm * pm, axis=0, keepdims=True)
            union_acc[...] += jnp.sum(tm + pm, axis=0, keepdims=True)

        @pl.when(jnp.logical_not(is_partial))
        def _full():
            inter_acc[...] += jnp.sum(t * p, axis=0, keepdims=True)
            union_acc[...] += jnp.sum(t + p, axis=0, keepdims=True)
    else:
        inter_acc[...] += jnp.sum(t * p, axis=0, keepdims=True)
        union_acc[...] += jnp.sum(t + p, axis=0, keepdims=True)

    @pl.when(k == nk - 1)
    def _finalize():
        inter_out[0] = inter_acc[...]
        union_out[0] = union_acc[...]


def _jnp_partials(yp_flat, yt_flat):
    p = jax.nn.sigmoid(yp_flat.astype(jnp.float32))
    t = yt_flat.astype(jnp.float32)
    return jnp.sum(t * p), jnp.sum(t) + jnp.sum(p)


@jax.jit
def combined_loss(y_pred, y_true):
    """Scalar loss = 100 * (1 - dice(y_true, sigmoid(y_pred)))."""
    n = y_pred.size
    yp = y_pred.reshape(-1)              # free for default row-major layouts
    yt = y_true.reshape(-1)

    rows = n // LANES
    rem = n - rows * LANES

    # <=127-element tail handled by a few plain XLA ops on the tail slice
    # (no jnp.pad / full-array copy before the kernel).
    if rem:
        inter_tail, union_tail = _jnp_partials(yp[rows * LANES:], yt[rows * LANES:])
    else:
        inter_tail = jnp.float32(0.0)
        union_tail = jnp.float32(0.0)

    if rows == 0:
        inter, union = inter_tail, union_tail
    else:
        if rem:
            yp2 = yp[: rows * LANES].reshape(rows, LANES)
            yt2 = yt[: rows * LANES].reshape(rows, LANES)
        else:
            yp2 = yp.reshape(rows, LANES)
            yt2 = yt.reshape(rows, LANES)

        # Block: full row extent for small inputs (single step), else a large
        # 8-aligned tile for HBM-roofline streaming.
        row_tile = rows if rows <= MAX_ROW_TILE else MAX_ROW_TILE
        total_blocks = -(-rows // row_tile)

        # Split across TensorCores only when >1 core was detected AND each core
        # gets enough blocks to be worth it (v5e/v6e: n_split == 1).
        n_split = _NUM_CORES if total_blocks >= _NUM_CORES * MIN_BLOCKS_PER_CORE else 1
        inner = -(-total_blocks // n_split)
        covered_blocks = n_split * inner

        if covered_blocks == total_blocks:
            in_map = lambda s, k: (s * inner + k, 0)
        else:
            # Overhang steps re-read the last valid block; the in-kernel mask
            # (driven by the *logical* block index) zeroes their contribution.
            in_map = lambda s, k: (jnp.minimum(s * inner + k, total_blocks - 1), 0)

        needs_mask = covered_blocks * row_tile != rows

        kernel = functools.partial(
            _dice_partials_kernel,
            inner_steps=inner,
            n_rows=rows,
            needs_mask=needs_mask,
        )

        if n_split > 1:
            # Real per-TensorCore sharding (plain "parallel" often doesn't).
            dim_sem = (getattr(pltpu, "CORE_PARALLEL", "parallel"),
                       getattr(pltpu, "ARBITRARY", "arbitrary"))
        else:
            dim_sem = ("arbitrary", "arbitrary")

        out_map = lambda s, k: (s, 0, 0)
        inter_parts, union_parts = pl.pallas_call(
            kernel,
            out_shape=(
                jax.ShapeDtypeStruct((n_split, 1, LANES), jnp.float32),
                jax.ShapeDtypeStruct((n_split, 1, LANES), jnp.float32),
            ),
            grid_spec=pltpu.PrefetchScalarGridSpec(
                num_scalar_prefetch=0,
                grid=(n_split, inner),
                in_specs=[
                    pl.BlockSpec((row_tile, LANES), in_map),
                    pl.BlockSpec((row_tile, LANES), in_map),
                ],
                out_specs=[
                    pl.BlockSpec((1, 1, LANES), out_map),
                    pl.BlockSpec((1, 1, LANES), out_map),
                ],
                scratch_shapes=[
                    pltpu.VMEM((1, LANES), jnp.float32),
                    pltpu.VMEM((1, LANES), jnp.float32),
                ],
            ),
            compiler_params=pltpu.CompilerParams(
                dimension_semantics=dim_sem,
                vmem_limit_bytes=VMEM_LIMIT_BYTES,
            ),
        )(yp2, yt2)

        inter = jnp.sum(inter_parts) + inter_tail
        union = jnp.sum(union_parts) + union_tail

    dice = 2.0 * inter / (union + jnp.float32(0.0001))
    return (1.0 - dice) * 100.0


def _reference(y_pred, y_true):
    p = jax.nn.sigmoid(y_pred.astype(jnp.float32).reshape(-1))
    t = y_true.astype(jnp.float32).reshape(-1)
    inter = jnp.sum(t * p)
    union = jnp.sum(t) + jnp.sum(p)
    dice = 2.0 * inter / (union + 0.0001)
    return (1.0 - dice) * 100.0


if __name__ == "__main__":
    key = jax.random.PRNGKey(0)
    k1, k2 = jax.random.split(key)

    # Small NCHW shapes, consistent with a segmentation-style logits/mask pair.
    y_pred = jax.random.normal(k1, (2, 4, 16, 16), dtype=jnp.float32)
    y_true = (jax.random.uniform(k2, (2, 4, 16, 16)) > 0.5).astype(jnp.float32)

    loss = combined_loss(y_pred, y_true)
    jax.block_until_ready(loss)
    ref = _reference(y_pred, y_true)
    assert jnp.allclose(loss, ref, rtol=1e-5, atol=1e-3), (loss, ref)

    # Non-lane-aligned size + bf16 inputs: exercises the plain-XLA tail path
    # and the in-kernel cast (narrow-dtype streaming is the biggest lever for
    # this HBM-bound reduction).
    k3, k4 = jax.random.split(k2)
    yp_b = jax.random.normal(k3, (997,), dtype=jnp.float32).astype(jnp.bfloat16)
    yt_b = (jax.random.uniform(k4, (997,)) > 0.5).astype(jnp.bfloat16)
    loss_b = combined_loss(yp_b, yt_b)
    jax.block_until_ready(loss_b)
    ref_b = _reference(yp_b, yt_b)
    assert jnp.allclose(loss_b, ref_b, rtol=1e-4, atol=1e-3), (loss_b, ref_b)

    print("KERNEL_OK")
</pallas_src>

<mosaic_0001>
module attributes {stable_mosaic.version = 11 : i64} {
  func.func @_dice_partials_kernel(%arg0: i32, %arg1: i32, %arg2: memref<16x128xf32, #tpu.memory_space<vmem>>, %arg3: memref<16x128xf32, #tpu.memory_space<vmem>>, %arg4: memref<1x1x128xf32, #tpu.memory_space<vmem>>, %arg5: memref<1x1x128xf32, #tpu.memory_space<vmem>>, %arg6: memref<1x128xf32, #tpu.memory_space<vmem>>, %arg7: memref<1x128xf32, #tpu.memory_space<vmem>>) attributes {dimension_semantics = [#tpu.dimension_semantics<arbitrary>, #tpu.dimension_semantics<arbitrary>], iteration_bounds = array<i64: 1, 1>, scalar_prefetch = 0 : i64, scratch_operands = 2 : i64, tpu.core_type = #tpu.core_type<tc>, window_params = [{transform_indices = @transform_0, window_bounds = array<i64: 16, 128>}, {transform_indices = @transform_1, window_bounds = array<i64: 16, 128>}, {transform_indices = @transform_2, window_bounds = array<i64: 1, 1, 128>}, {transform_indices = @transform_3, window_bounds = array<i64: 1, 1, 128>}]} {
    %c0_i32 = arith.constant 0 : i32
    %0 = arith.cmpi eq, %arg1, %c0_i32 : i32
    %1 = arith.extui %0 : i1 to i32
    %c0_i32_0 = arith.constant 0 : i32
    %2 = arith.cmpi ne, %1, %c0_i32_0 : i32
    scf.if %2 {
      %cst_16 = arith.constant 0.000000e+00 : f32
      %25 = vector.broadcast %cst_16 : f32 to vector<1x128xf32>
      %c0_17 = arith.constant 0 : index
      %c0_18 = arith.constant 0 : index
      %26 = vector.load %arg6[%c0_17, %c0_18] : memref<1x128xf32, #tpu.memory_space<vmem>>, vector<1x128xf32>
      tpu.vector_store %arg6[%c0_17, %c0_18], %25 {strides = array<i32>} : memref<1x128xf32, #tpu.memory_space<vmem>>, vector<1x128xf32>,
      %cst_19 = arith.constant 0.000000e+00 : f32
      %27 = vector.broadcast %cst_19 : f32 to vector<1x128xf32>
      %c0_20 = arith.constant 0 : index
      %c0_21 = arith.constant 0 : index
      %28 = vector.load %arg7[%c0_20, %c0_21] : memref<1x128xf32, #tpu.memory_space<vmem>>, vector<1x128xf32>
      tpu.vector_store %arg7[%c0_20, %c0_21], %27 {strides = array<i32>} : memref<1x128xf32, #tpu.memory_space<vmem>>, vector<1x128xf32>,
    } else {
    }
    %c0 = arith.constant 0 : index
    %c0_1 = arith.constant 0 : index
    %3 = vector.load %arg2[%c0, %c0_1] : memref<16x128xf32, #tpu.memory_space<vmem>>, vector<16x128xf32>
    %4 = arith.negf %3 : vector<16x128xf32>
    %5 = math.exp %4 : vector<16x128xf32>
    %cst = arith.constant 1.000000e+00 : f32
    %6 = vector.broadcast %cst : f32 to vector<16x128xf32>
    %7 = arith.addf %6, %5 : vector<16x128xf32>
    %8 = arith.divf %6, %7 : vector<16x128xf32>
    %c0_2 = arith.constant 0 : index
    %c0_3 = arith.constant 0 : index
    %9 = vector.load %arg3[%c0_2, %c0_3] : memref<16x128xf32, #tpu.memory_space<vmem>>, vector<16x128xf32>
    %c0_4 = arith.constant 0 : index
    %c0_5 = arith.constant 0 : index
    %10 = vector.load %arg6[%c0_4, %c0_5] : memref<1x128xf32, #tpu.memory_space<vmem>>, vector<1x128xf32>
    %11 = arith.mulf %9, %8 : vector<16x128xf32>
    %cst_6 = arith.constant dense<0.000000e+00> : vector<128xf32>
    %12 = vector.multi_reduction <add>, %11, %cst_6 [0] : vector<16x128xf32> to vector<128xf32>
    %13 = vector.shape_cast %12 : vector<128xf32> to vector<1x128xf32>
    %14 = arith.addf %10, %13 : vector<1x128xf32>
    %c0_7 = arith.constant 0 : index
    %c0_8 = arith.constant 0 : index
    %15 = vector.load %arg6[%c0_7, %c0_8] : memref<1x128xf32, #tpu.memory_space<vmem>>, vector<1x128xf32>
    tpu.vector_store %arg6[%c0_7, %c0_8], %14 {strides = array<i32>} : memref<1x128xf32, #tpu.memory_space<vmem>>, vector<1x128xf32>,
    %c0_9 = arith.constant 0 : index
    %c0_10 = arith.constant 0 : index
    %16 = vector.load %arg7[%c0_9, %c0_10] : memref<1x128xf32, #tpu.memory_space<vmem>>, vector<1x128xf32>
    %17 = arith.addf %9, %8 : vector<16x128xf32>
    %cst_11 = arith.constant dense<0.000000e+00> : vector<128xf32>
    %18 = vector.multi_reduction <add>, %17, %cst_11 [0] : vector<16x128xf32> to vector<128xf32>
    %19 = vector.shape_cast %18 : vector<128xf32> to vector<1x128xf32>
    %20 = arith.addf %16, %19 : vector<1x128xf32>
    %c0_12 = arith.constant 0 : index
    %c0_13 = arith.constant 0 : index
    %21 = vector.load %arg7[%c0_12, %c0_13] : memref<1x128xf32, #tpu.memory_space<vmem>>, vector<1x128xf32>
    tpu.vector_store %arg7[%c0_12, %c0_13], %20 {strides = array<i32>} : memref<1x128xf32, #tpu.memory_space<vmem>>, vector<1x128xf32>,
    %c0_i32_14 = arith.constant 0 : i32
    %22 = arith.cmpi eq, %arg1, %c0_i32_14 : i32
    %23 = arith.extui %22 : i1 to i32
    %c0_i32_15 = arith.constant 0 : i32
    %24 = arith.cmpi ne, %23, %c0_i32_15 : i32
    scf.if %24 {
      %c0_16 = arith.constant 0 : index
      %c0_17 = arith.constant 0 : index
      %25 = vector.load %arg6[%c0_16, %c0_17] : memref<1x128xf32, #tpu.memory_space<vmem>>, vector<1x128xf32>
      %c0_18 = arith.constant 0 : index
      %c0_19 = arith.constant 0 : index
      %c0_20 = arith.constant 0 : index
      %26 = vector.load %arg4[%c0_18, %c0_19, %c0_20] : memref<1x1x128xf32, #tpu.memory_space<vmem>>, vector<1x1x128xf32>
      %27 = vector.shape_cast %26 : vector<1x1x128xf32> to vector<1x128xf32>
      %28 = vector.shape_cast %25 : vector<1x128xf32> to vector<1x1x128xf32>
      tpu.vector_store %arg4[%c0_18, %c0_19, %c0_20], %28 {strides = array<i32>} : memref<1x1x128xf32, #tpu.memory_space<vmem>>, vector<1x1x128xf32>,
      %c0_21 = arith.constant 0 : index
      %c0_22 = arith.constant 0 : index
      %29 = vector.load %arg7[%c0_21, %c0_22] : memref<1x128xf32, #tpu.memory_space<vmem>>, vector<1x128xf32>
      %c0_23 = arith.constant 0 : index
      %c0_24 = arith.constant 0 : index
      %c0_25 = arith.constant 0 : index
      %30 = vector.load %arg5[%c0_23, %c0_24, %c0_25] : memref<1x1x128xf32, #tpu.memory_space<vmem>>, vector<1x1x128xf32>
      %31 = vector.shape_cast %30 : vector<1x1x128xf32> to vector<1x128xf32>
      %32 = vector.shape_cast %29 : vector<1x128xf32> to vector<1x1x128xf32>
      tpu.vector_store %arg5[%c0_23, %c0_24, %c0_25], %32 {strides = array<i32>} : memref<1x1x128xf32, #tpu.memory_space<vmem>>, vector<1x1x128xf32>,
    } else {
    }
    return
  }
  func.func @transform_0(%arg0: i32, %arg1: i32) -> (i32, i32) {
    %c1_i32 = arith.constant 1 : i32
    %0 = arith.muli %arg0, %c1_i32 : i32
    %1 = arith.addi %0, %arg1 : i32
    %c0_i32 = arith.constant 0 : i32
    %c0_i32_0 = arith.constant 0 : i32
    return %1, %c0_i32 : i32, i32
  }
  func.func @transform_1(%arg0: i32, %arg1: i32) -> (i32, i32) {
    %c1_i32 = arith.constant 1 : i32
    %0 = arith.muli %arg0, %c1_i32 : i32
    %1 = arith.addi %0, %arg1 : i32
    %c0_i32 = arith.constant 0 : i32
    %c0_i32_0 = arith.constant 0 : i32
    return %1, %c0_i32 : i32, i32
  }
  func.func @transform_2(%arg0: i32, %arg1: i32) -> (i32, i32, i32) {
    %c0_i32 = arith.constant 0 : i32
    %c0_i32_0 = arith.constant 0 : i32
    %c0_i32_1 = arith.constant 0 : i32
    return %arg0, %c0_i32, %c0_i32_0 : i32, i32, i32
  }
  func.func @transform_3(%arg0: i32, %arg1: i32) -> (i32, i32, i32) {
    %c0_i32 = arith.constant 0 : i32
    %c0_i32_0 = arith.constant 0 : i32
    %c0_i32_1 = arith.constant 0 : i32
    return %arg0, %c0_i32, %c0_i32_0 : i32, i32, i32
  }
}

</mosaic_0001>

<bundles_post_ra>
// kernel: combined_loss.1
= control target key start
LH: loop header
LB: loop body
LE: loop exit
PB: predicated region body
PF: predicated region fallthrough
CT: control target
= control target key end

     0   :  { %v141_v0 = vmov 0.0   ;;  %s180_s0 = inlined_call_operand.vmem [shape: f32[16,128], index: 0, kind: input, shape index: {}]   ;;  %s181_s1 = inlined_call_operand.vmem [shape: f32[16,128], index: 1, kind: input, shape index: {}]   ;;  %s182_s2 = inlined_call_operand.vmem [shape: f32[1,1,128], index: 2, kind: output, shape index: {0}]   ;;  %s183_s3 = inlined_call_operand.vmem [shape: f32[1,1,128], index: 3, kind: output, shape index: {1}]  }
   0x1   :  { %61 = vst [vmem:[#allocation2] sm:$0x1] %v141_v0  ;;  %62 = vst [vmem:[#allocation3] sm:$0x1] %v141_v0  ;;  %v63_v1 = vld [vmem:[%s180_s0] sm:$0xff]  ;;  %v64_v2 = vld [vmem:[%s180_s0 + $0x8] sm:$0xff] }
   0x2   :  { %v130_v3 = vmul.f32 -1.442695, %v63_v1  ;;  %v131_v4 = vmul.f32 -1.442695, %v64_v2  ;;  %v77_v9 = vld [vmem:[%s181_s1] sm:$0xff]  ;;  %v78_v10 = vld [vmem:[%s181_s1 + $0x8] sm:$0xff] }
   0x4   :  { %133 = vpow2.f32 %v130_v3 }
   0x5   :  { %135 = vpow2.f32 %v131_v4 }
   0x8   :  { %v79_v29 = vld [vmem:[#allocation2] sm:$0x1]  ;;  %v91_v30 = vld [vmem:[#allocation3] sm:$0x1] }
  0x11   :  { %v134_v5 = vpop.eup %133 }
  0x12   :  { %v136_v6 = vpop.eup %135  ;;  %v71_v7 = vadd.f32 1.0, %v134_v5 }
  0x13   :  { %v72_v8 = vadd.f32 1.0, %v136_v6 }
  0x14   :  { %137 = vrcp.f32 %v71_v7 }
  0x15   :  { %139 = vrcp.f32 %v72_v8 }
  0x21   :  { %v138_v11 = vpop.eup %137 }
  0x22   :  { %v140_v12 = vpop.eup %139  ;;  %v80_v13 = vmul.f32 %v138_v11, %v77_v9  ;;  %v92_v14 = vadd.f32 %v138_v11, %v77_v9 }
  0x23   :  { %v81_v15 = vmul.f32 %v140_v12, %v78_v10  ;;  %v93_v16 = vadd.f32 %v140_v12, %v78_v10 }
  0x25   :  { %v82_v17 = vadd.f32 %v81_v15, %v80_v13  ;;  %v94_v18 = vadd.f32 %v93_v16, %v92_v14 }
  0x27   :  { %v83_v19 = vrot.slane %v82_v17, 4  ;;  %v95_v20 = vrot.slane %v94_v18, 4 }
  0x29   :  { %v84_v21 = vadd.f32 %v83_v19, %v82_v17  ;;  %v96_v22 = vadd.f32 %v95_v20, %v94_v18 }
  0x2b   :  { %v85_v23 = vrot.slane %v84_v21, 2  ;;  %v97_v24 = vrot.slane %v96_v22, 2 }
  0x2d   :  { %v86_v25 = vadd.f32 %v85_v23, %v84_v21  ;;  %v98_v26 = vadd.f32 %v97_v24, %v96_v22 }
  0x2f   :  { %v87_v27 = vrot.slane %v86_v25, 1  ;;  %v99_v28 = vrot.slane %v98_v26, 1 }
  0x31   :  { %v88_v31 = vadd.f32 %v87_v27, %v86_v25  ;;  %v100_v32 = vadd.f32 %v99_v28, %v98_v26 }
  0x33   :  { %v89_v33 = vadd.f32 %v88_v31, %v79_v29  ;;  %v101_v34 = vadd.f32 %v100_v32, %v91_v30 }
  0x35   :  { %90 = vst [vmem:[#allocation2] sm:$0x1] %v89_v33  ;;  %102 = vst [vmem:[#allocation3] sm:$0x1] %v101_v34 }
  0x3c   :  { %v106_v35 = vld [vmem:[#allocation2] sm:$0x1]  ;;  %v108_v36 = vld [vmem:[#allocation3] sm:$0x1] }
  0x3d   :  { %107 = vst [vmem:[%s182_s2] sm:$0x1] %v106_v35  ;;  %109 = vst [vmem:[%s183_s3] sm:$0x1] %v108_v36 }

</bundles_post_ra>
